<compile_context>
chip_gen: v7x
topology: tpu7x:2x2x1
jax: 0.10.0
libtpu: 0.0.40
codegen_flags: <defaults>
</compile_context>

<pallas_src>
import functools

import jax
import jax.numpy as jnp
import numpy as np
from jax import lax
from jax.experimental import pallas as pl
from jax.experimental.pallas import tpu as pltpu


def adjmat_v1v2_inlayer(n, m, bias):
    """NumPy port of AdjMat_V1V2_inlayer (connectivity mask for the weights)."""
    total_length = 2 * n + m + int(bias)
    adj = np.zeros((total_length, total_length), dtype=np.float32)
    for i in range(n):
        adj[i, :] = 1
        adj[i, i] = 0
        adj[i, n:n + n] = 0
    for i in range(n, 2 * n):
        adj[i, :] = 1
        adj[i, i] = 0
        adj[i, 0:n] = 0
    for i in range(2 * n, 2 * n + m):
        adj[i, :] = 1
        adj[i, 2 * n:2 * n + m] = 0
    if bias:
        adj[total_length - 1, :] = 1
        adj[:, total_length - 1] = 1
    return adj


def _round_up(x, m):
    return ((x + m - 1) // m) * m


# -----------------------------------------------------------------------------
# General kernel: sequential Gibbs sweep over the free units.
# -----------------------------------------------------------------------------
def _bm_sweep_kernel(order_ref, thresh_ref, w_ref, state_ref, out_ref, *, unroll):
    """Sequential sweep; each update sees all previous updates.

    order_ref : SMEM int32 (n_free,)  visit order (clamped units pre-filtered)
    thresh_ref: SMEM f32   (n_free,)  precomputed T * logit(rand) per step
    w_ref     : VMEM f32   (NR, NP)   zero-padded weight matrix
    state_ref : VMEM f32   (1, NP)    zero-padded initial state
    out_ref   : VMEM f32   (1, NP)    updated state
    """
    n_free = order_ref.shape[0]
    lane_ids = lax.broadcasted_iota(jnp.int32, state_ref.shape, 1)

    def body(step, state):
        j = order_ref[step]
        row = w_ref[pl.ds(j, 1), :]                        # (1, NP)
        s = jnp.sum(row * state, axis=1, keepdims=True)    # (1, 1)
        # rand <= sigmoid(s/T)  <=>  s >= T * logit(rand)   (T > 0)
        sampled = jnp.where(s >= thresh_ref[step],
                            jnp.float32(1.0), jnp.float32(0.0))
        return jnp.where(lane_ids == j, sampled, state)

    out_ref[...] = lax.fori_loop(0, n_free, body, state_ref[...], unroll=unroll)


# -----------------------------------------------------------------------------
# Fast-path kernel: free units are conditionally independent
# (w[free, free] == 0), so one matmul computes every pre-activation at once.
# -----------------------------------------------------------------------------
def _bm_independent_kernel(state_ref, wT_ref, thresh_ref, scatter_ref,
                           keep_ref, out_ref):
    """state(1,NP) @ wT(NP,NF) -> threshold -> matmul-scatter back into state."""
    s = jnp.dot(state_ref[...], wT_ref[...],
                preferred_element_type=jnp.float32)                 # (1, NF)
    sampled = jnp.where(s >= thresh_ref[...],
                        jnp.float32(1.0), jnp.float32(0.0))         # (1, NF)
    upd = jnp.dot(sampled, scatter_ref[...],
                  preferred_element_type=jnp.float32)               # (1, NP)
    out_ref[...] = state_ref[...] * keep_ref[...] + upd


# -----------------------------------------------------------------------------
# Wrapper: one Gibbs sweep (BoltzmannMachine.forward); returns updated state.
# -----------------------------------------------------------------------------
def boltzmann_forward(w, initial_state, clamping_degree, perm, rands,
                      temperature, allow_fast_path=True):
    w = np.asarray(w, dtype=np.float32)
    state = np.asarray(initial_state, dtype=np.float32)
    clamp = np.asarray(clamping_degree)
    perm = np.asarray(perm).astype(np.int64)
    rands = np.asarray(rands).astype(np.float64)
    T = float(temperature)

    n = w.shape[0]
    NP = _round_up(max(n, 128), 128)     # lane padding (supports n > 128 too)
    NR = _round_up(max(n, 8), 8)         # sublane padding

    # Host-side filtering: clamped units are pure no-ops in the reference loop.
    free_steps = np.nonzero(clamp[perm] == 0)[0]
    free_order = perm[free_steps].astype(np.int32)
    n_free = int(free_order.size)
    if n_free == 0:
        return jnp.asarray(state)

    # Precomputed logit thresholds (temperature folded in).
    r = rands[free_steps]
    with np.errstate(divide="ignore"):
        thresh = (T * np.log(r / (1.0 - r))).astype(np.float32)

    w_p = np.zeros((NR, NP), np.float32)
    w_p[:n, :n] = w
    state_p = np.zeros((1, NP), np.float32)
    state_p[0, :n] = state

    vmem_limit = int(min(96 * 2**20, max(4 * 2**20, 4 * w_p.nbytes)))
    cparams = pltpu.CompilerParams(vmem_limit_bytes=vmem_limit)

    # Fast path: no free unit depends on another free unit -> whole sweep is
    # one MXU pass + vectorized threshold (no serial loop at all).
    if allow_fast_path and not np.any(w[np.ix_(free_order, free_order)]):
        NF = _round_up(max(n_free, 128), 128)
        wT = np.zeros((NP, NF), np.float32)
        wT[:n, :n_free] = w[free_order, :].T
        thresh_row = np.full((1, NF), np.inf, np.float32)
        thresh_row[0, :n_free] = thresh
        scatter = np.zeros((NF, NP), np.float32)
        scatter[np.arange(n_free), free_order] = 1.0
        keep = np.ones((1, NP), np.float32)
        keep[0, free_order] = 0.0

        out = pl.pallas_call(
            _bm_independent_kernel,
            out_shape=jax.ShapeDtypeStruct((1, NP), jnp.float32),
            in_specs=[pl.BlockSpec(memory_space=pltpu.MemorySpace.VMEM)] * 5,
            out_specs=pl.BlockSpec(memory_space=pltpu.MemorySpace.VMEM),
            compiler_params=cparams,
        )(jnp.asarray(state_p), jnp.asarray(wT), jnp.asarray(thresh_row),
          jnp.asarray(scatter), jnp.asarray(keep))
        return out[0, :n]

    # General path: sequential sweep with vreg-carried state, unrolled loop.
    unroll = True if n_free <= 32 else 8
    out = pl.pallas_call(
        functools.partial(_bm_sweep_kernel, unroll=unroll),
        out_shape=jax.ShapeDtypeStruct((1, NP), jnp.float32),
        in_specs=[
            pl.BlockSpec(memory_space=pltpu.MemorySpace.SMEM),   # visit order
            pl.BlockSpec(memory_space=pltpu.MemorySpace.SMEM),   # thresholds
            pl.BlockSpec(memory_space=pltpu.MemorySpace.VMEM),   # w (padded)
            pl.BlockSpec(memory_space=pltpu.MemorySpace.VMEM),   # state (padded)
        ],
        out_specs=pl.BlockSpec(memory_space=pltpu.MemorySpace.VMEM),
        compiler_params=cparams,
    )(jnp.asarray(free_order), jnp.asarray(thresh),
      jnp.asarray(w_p), jnp.asarray(state_p))
    return out[0, :n]


if __name__ == "__main__":
    # Small, forward-consistent shapes: nv visible + nh hidden units, no bias.
    nv, nh, bias = 8, 6, False
    n = nv + nh + int(bias)

    key = jax.random.PRNGKey(0)
    k_w, k_state, k_perm, k_rand = jax.random.split(key, 4)

    # Deterministic parameter init. The torch module initializes w to zeros;
    # here we use small symmetric random weights masked by the same adjacency
    # so the sweep exercises non-trivial probabilities.
    adj = adjmat_v1v2_inlayer(nv // 2, nh, bias)
    w = np.asarray(jax.random.normal(k_w, (n, n), jnp.float32)) * 0.1
    w = (0.5 * (w + w.T) * adj).astype(np.float32)

    # initial_state / clamping_degree as in GoToEquilibriumState:
    # visible units clamped (first nv), hidden units free.
    initial_state = np.asarray(
        jax.random.bernoulli(k_state, 0.5, (n,)), np.float32)
    clamping_degree = np.concatenate(
        [np.ones((nv,), np.int32), np.zeros((nh,), np.int32)])

    # Host-side deterministic randomness replacing torch.randperm / torch.rand.
    perm = np.asarray(jax.random.permutation(k_perm, n))
    rands = np.asarray(jax.random.uniform(k_rand, (n,), jnp.float32))

    T = 1.0
    # Fast path: visible clamped + hidden-hidden weights zeroed by the
    # adjacency -> free units are conditionally independent -> single matmul.
    out_fast = boltzmann_forward(w, initial_state, clamping_degree, perm,
                                 rands, T, allow_fast_path=True)
    # General sequential-sweep kernel on the same inputs.
    out_seq = boltzmann_forward(w, initial_state, clamping_degree, perm,
                                rands, T, allow_fast_path=False)
    jax.block_until_ready((out_fast, out_seq))

    out_fast = np.asarray(out_fast)
    out_seq = np.asarray(out_seq)

    for out in (out_fast, out_seq):
        assert out.shape == (n,)
        assert np.all(out[:nv] == initial_state[:nv])     # clamped unchanged
        assert np.all((out == 0.0) | (out == 1.0))        # binary states
    # With zero free-free coupling both formulations are mathematically equal.
    assert np.array_equal(out_fast, out_seq)

    # TODO(synk): set_backhook (gradient filtering) and training_step are
    # backward/optimizer-time logic with no forward-kernel equivalent.
    print("KERNEL_OK")
</pallas_src>

<mosaic_0001>
module attributes {stable_mosaic.version = 11 : i64} {
  func.func @_bm_independent_kernel(%arg0: memref<1x128xf32, #tpu.memory_space<vmem>>, %arg1: memref<128x128xf32, #tpu.memory_space<vmem>>, %arg2: memref<1x128xf32, #tpu.memory_space<vmem>>, %arg3: memref<128x128xf32, #tpu.memory_space<vmem>>, %arg4: memref<1x128xf32, #tpu.memory_space<vmem>>, %arg5: memref<1x128xf32, #tpu.memory_space<vmem>>) attributes {dimension_semantics = [], scalar_prefetch = 0 : i64, scratch_operands = 0 : i64, tpu.core_type = #tpu.core_type<tc>} {
    %c0 = arith.constant 0 : index
    %c0_0 = arith.constant 0 : index
    %0 = vector.load %arg0[%c0, %c0_0] : memref<1x128xf32, #tpu.memory_space<vmem>>, vector<1x128xf32>
    %c0_1 = arith.constant 0 : index
    %c0_2 = arith.constant 0 : index
    %1 = vector.load %arg1[%c0_1, %c0_2] : memref<128x128xf32, #tpu.memory_space<vmem>>, vector<128x128xf32>
    %cst = arith.constant dense<0.000000e+00> : vector<1x128xf32>
    %2 = tpu.matmul %0, %1, %cst {dimension_numbers = #tpu.dot_dimension_numbers<[1], [0], [0], [1], [0, 0, 1, 1], [], []>} : vector<1x128xf32>, vector<128x128xf32>, vector<1x128xf32> -> vector<1x128xf32>
    %c0_3 = arith.constant 0 : index
    %c0_4 = arith.constant 0 : index
    %3 = vector.load %arg2[%c0_3, %c0_4] : memref<1x128xf32, #tpu.memory_space<vmem>>, vector<1x128xf32>
    %4 = arith.cmpf oge, %2, %3 : vector<1x128xf32>
    %cst_5 = arith.constant 1.000000e+00 : f32
    %cst_6 = arith.constant 0.000000e+00 : f32
    %5 = vector.broadcast %cst_5 : f32 to vector<1x128xf32>
    %6 = vector.broadcast %cst_6 : f32 to vector<1x128xf32>
    %7 = arith.select %4, %5, %6 : vector<1x128xi1>, vector<1x128xf32>
    %c0_7 = arith.constant 0 : index
    %c0_8 = arith.constant 0 : index
    %8 = vector.load %arg3[%c0_7, %c0_8] : memref<128x128xf32, #tpu.memory_space<vmem>>, vector<128x128xf32>
    %cst_9 = arith.constant dense<0.000000e+00> : vector<1x128xf32>
    %9 = tpu.matmul %7, %8, %cst_9 {dimension_numbers = #tpu.dot_dimension_numbers<[1], [0], [0], [1], [0, 0, 1, 1], [], []>} : vector<1x128xf32>, vector<128x128xf32>, vector<1x128xf32> -> vector<1x128xf32>
    %c0_10 = arith.constant 0 : index
    %c0_11 = arith.constant 0 : index
    %10 = vector.load %arg0[%c0_10, %c0_11] : memref<1x128xf32, #tpu.memory_space<vmem>>, vector<1x128xf32>
    %c0_12 = arith.constant 0 : index
    %c0_13 = arith.constant 0 : index
    %11 = vector.load %arg4[%c0_12, %c0_13] : memref<1x128xf32, #tpu.memory_space<vmem>>, vector<1x128xf32>
    %12 = arith.mulf %10, %11 : vector<1x128xf32>
    %13 = arith.addf %12, %9 : vector<1x128xf32>
    %c0_14 = arith.constant 0 : index
    %c0_15 = arith.constant 0 : index
    %14 = vector.load %arg5[%c0_14, %c0_15] : memref<1x128xf32, #tpu.memory_space<vmem>>, vector<1x128xf32>
    tpu.vector_store %arg5[%c0_14, %c0_15], %13 {strides = array<i32>} : memref<1x128xf32, #tpu.memory_space<vmem>>, vector<1x128xf32>,
    return
  }
}

</mosaic_0001>

<bundles_post_ra>
// kernel: tpu_custom_call.1
= control target key start
LH: loop header
LB: loop body
LE: loop exit
PB: predicated region body
PF: predicated region fallthrough
CT: control target
= control target key end

     0   :  { %10 = vsyncpa [#allocation3], 0  ;;  %s629_s0 = inlined_call_operand.hbm [shape: f32[1,128], index: 0, kind: input, shape index: {}]   ;;  %s630_s1 = inlined_call_operand.hbm [shape: f32[128,128], index: 1, kind: input, shape index: {}]   ;;  %s631_s2 = inlined_call_operand.vmem [shape: f32[1,128], index: 2, kind: input, shape index: {}]   ;;  %s632_s3 = inlined_call_operand.hbm [shape: f32[128,128], index: 3, kind: input, shape index: {}]   ;;  %s633_s4 = inlined_call_operand.vmem [shape: f32[1,128], index: 4, kind: input, shape index: {}]   ;;  %s634_s5 = inlined_call_operand.hbm [shape: f32[1,128], index: 5, kind: output, shape index: {}]  }
   0x1   :  { %11 = vsyncpa [#allocation6], 0 }
   0x2   :  { %12 = vsyncpa [#allocation4], 0  ;;  %s513_s18 = smov [#allocation5]   ;;  %s419_s22 = scalar_lea.hbm %s630_s1, 2048 }
   0x3   :  { %s28_s19 = sshll.u32 %s513_s18, 4  ;;  %p420_p0 = scmp.ne.s32.totalorder %s630_s1, %s419_s22  ;;  %s29_s19 = int_to_ptr.vmem [resolvable:$true] %s28_s19 }
   0x4   :  { %p423_p1 = scmp.lt.u32.totalorder %s419_s22, %s630_s1 }
   0x6   :  { %p425_p2 = pnand %p423_p1, %p420_p0 }
   0x8   :  { %428 = shalt.err (!%p425_p2)
}
   0x9   :  { %s429_s27 = scalar_lea.vmem %s29_s19, 2048  ;;  %p434_p4 = scmp.lt.s32.totalorder %s29_s19, %s29_s19 }
   0xa   :  { %p430_p3 = scmp.ne.s32.totalorder %s29_s19, %s429_s27  ;;  %p435_p5 = scmp.lt.s32.totalorder %s429_s27, %s429_s27 }
   0xc   :  { %p436_p6 = por %p435_p5, %p434_p4 }
   0xe   :  { %p437_p7 = pnand %p436_p6, %p430_p3 }
  0x10   :  { %440 = shalt.err (!%p437_p7)
}
  0x11   :  { %s514_s28 = smov 128   ;;  %s515_s29 = smov 8  }
  0x12   :  { %34 = dma.hbm_to_vmem [thread:$0]  %s630_s1, 2048, %s29_s19, [#allocation6], %s514_s28, %s514_s28, %s515_s29  }
  0x13   :  { %s516_s7 = smov [#allocation2]   ;;  %s517_s9 = smov [#allocation7]  }
  0x14   :  { %s19_s8 = sshll.u32 %s516_s7, 4  ;;  %s42_s10 = sshll.u32 %s517_s9, 4  ;;  %s20_s8 = int_to_ptr.vmem [resolvable:$true] %s19_s8  ;;  %s43_s10 = int_to_ptr.vmem [resolvable:$true] %s42_s10 }
  0x15   :  { %s441_s13 = scalar_lea.hbm %s629_s0, 16 }
  0x16   :  { %p442_p8 = scmp.ne.s32.totalorder %s629_s0, %s441_s13  ;;  %p445_p9 = scmp.lt.u32.totalorder %s441_s13, %s629_s0 }
  0x18   :  { %p447_p10 = pnand %p445_p9, %p442_p8 }
  0x1a   :  { %450 = shalt.err (!%p447_p10)
}
  0x1b   :  { %s451_s1 = scalar_lea.vmem %s20_s8, 16  ;;  %s455_s18 = scalar_lea.vmem %s20_s8, 32 }
  0x1c   :  { %p452_p11 = scmp.ne.s32.totalorder %s20_s8, %s451_s1  ;;  %p456_p12 = scmp.lt.s32.totalorder %s20_s8, %s20_s8 }
  0x1d   :  { %p457_p13 = scmp.lt.s32.totalorder %s455_s18, %s451_s1 }
  0x1f   :  { %p458_p0 = por %p457_p13, %p456_p12 }
  0x21   :  { %p459_p1 = pnand %p458_p0, %p452_p11 }
  0x23   :  { %462 = shalt.err (!%p459_p1)
}
  0x24   :  { %22 = dma.hbm_to_vmem [thread:$0]  %s629_s0, 16, %s20_s8, [#allocation3]  }
  0x25   :  { %s463_s23 = scalar_lea.hbm %s632_s3, 2048 }
  0x26   :  { %p464_p2 = scmp.ne.s32.totalorder %s632_s3, %s463_s23  ;;  %p467_p3 = scmp.lt.u32.totalorder %s463_s23, %s632_s3 }
  0x28   :  { %p469_p4 = pnand %p467_p3, %p464_p2 }
  0x2a   :  { %472 = shalt.err (!%p469_p4)
}
  0x2b   :  { %s473_s30 = scalar_lea.vmem %s43_s10, 2048  ;;  %p478_p6 = scmp.lt.s32.totalorder %s43_s10, %s43_s10 }
  0x2c   :  { %p474_p5 = scmp.ne.s32.totalorder %s43_s10, %s473_s30  ;;  %p479_p7 = scmp.lt.s32.totalorder %s473_s30, %s473_s30 }
  0x2e   :  { %p480_p8 = por %p479_p7, %p478_p6 }
  0x30   :  { %p481_p9 = pnand %p480_p8, %p474_p5 }
  0x32   :  { %484 = shalt.err (!%p481_p9)
}
  0x33   :  { %48 = dma.hbm_to_vmem [thread:$0]  %s632_s3, 2048, %s43_s10, [#allocation6], %s514_s28, %s514_s28, %s515_s29  }
  0x34   :  { %507 = dma.done.wait [#allocation3], 16  }
  0x35   :  { %508 = vsyncadd [#allocation3], 4294967280 }
  0x36   :  { %509 = dma.done.wait [#allocation6], 4096  }
  0x37   :  { %510 = vsyncadd [#allocation6], 4294963200  ;;  %v518_v0 = vmov 0.0|0.0   ;;  %vm519_vm0 = vmmov 0   ;;  %v520_v1 = vmov 0.0   ;;  %v61_v2 = vld [vmem:[#allocation5] sm:$0xff] }
  0x38   :  { %361 = vmatprep.subr.bf16.mxu0 %v518_v0  ;;  %323 = vmatprep.mubr.msk.f32.mxu0 %vm519_vm0, %v520_v1  ;;  %v62_v3 = vld [vmem:[#allocation5 + $0x8] sm:$0xff]  ;;  %v63_v4 = vld [vmem:[#allocation5 + $0x10] sm:$0xff]  ;;  %v64_v6 = vld [vmem:[#allocation5 + $0x18] sm:$0xff]  ;;  %v521_v54 = vmov 1.0   ;;  %s522_s8 = smov [#allocation8]  }
  0x39   :  { %385 = vmatprep.subr.bf16.mxu1 %v518_v0  ;;  %358 = vmatprep.mubr.msk.f32.mxu1 %vm519_vm0, %v520_v1  ;;  %v362_v5 = vpack.c.bf16 %v62_v3, %v61_v2  ;;  %v365_v7 = vpack.c.bf16 %v64_v6, %v63_v4  ;;  %v65_v8 = vld [vmem:[#allocation5 + $0x20] sm:$0xff]  ;;  %v66_v9 = vld [vmem:[#allocation5 + $0x28] sm:$0xff]  ;;  %v152_v12 = vld [vmem:[#allocation7 + $0x10] sm:$0xff]  ;;  %s246_s9 = sshll.u32 %s522_s8, 4  ;;  %s247_s9 = int_to_ptr.vmem [resolvable:$true] %s246_s9 }
  0x3a   :  { %v150_v10 = vld [vmem:[#allocation7] sm:$0xff]  ;;  %v151_v11 = vld [vmem:[#allocation7 + $0x8] sm:$0xff]  ;;  %v153_v13 = vld [vmem:[#allocation7 + $0x18] sm:$0xff]  ;;  %v368_v14 = vpack.c.bf16 %v66_v9, %v65_v8  ;;  %s485_s10 = scalar_lea.vmem %s247_s9, 16  ;;  %p490_p11 = scmp.lt.s32.totalorder %s247_s9, %s247_s9 }
  0x3b   :  { %363 = vmatpush3.bf16.msra.mxu0 %v362_v5  ;;  %v386_v15 = vpack.c.bf16 %v151_v11, %v150_v10  ;;  %v67_v16 = vld [vmem:[#allocation5 + $0x30] sm:$0xff]  ;;  %v68_v17 = vld [vmem:[#allocation5 + $0x38] sm:$0xff]  ;;  %v389_v18 = vpack.c.bf16 %v153_v13, %v152_v12  ;;  %v154_v19 = vld [vmem:[#allocation7 + $0x20] sm:$0xff]  ;;  %p486_p10 = scmp.ne.s32.totalorder %s247_s9, %s485_s10 }
  0x3c   :  { %364 = vmatprep.subr.bf16.mxu0 %v518_v0  ;;  %v155_v20 = vld [vmem:[#allocation7 + $0x28] sm:$0xff]  ;;  %v371_v21 = vpack.c.bf16 %v68_v17, %v67_v16  ;;  %v69_v22 = vld [vmem:[#allocation5 + $0x40] sm:$0xff]  ;;  %v156_v25 = vld [vmem:[#allocation7 + $0x30] sm:$0xff] }
  0x3d   :  { %387 = vmatpush3.bf16.msra.mxu1 %v386_v15  ;;  %v70_v23 = vld [vmem:[#allocation5 + $0x48] sm:$0xff]  ;;  %v392_v24 = vpack.c.bf16 %v155_v20, %v154_v19  ;;  %v157_v26 = vld [vmem:[#allocation7 + $0x38] sm:$0xff]  ;;  %v71_v28 = vld [vmem:[#allocation5 + $0x50] sm:$0xff] }
  0x3e   :  { %388 = vmatprep.subr.bf16.mxu1 %v518_v0  ;;  %v374_v27 = vpack.c.bf16 %v70_v23, %v69_v22  ;;  %v72_v29 = vld [vmem:[#allocation5 + $0x58] sm:$0xff]  ;;  %v395_v30 = vpack.c.bf16 %v157_v26, %v156_v25  ;;  %v158_v31 = vld [vmem:[#allocation7 + $0x40] sm:$0xff]  ;;  %v159_v32 = vld [vmem:[#allocation7 + $0x48] sm:$0xff] }
  0x3f   :  { %366 = vmatpush3.bf16.msra.mxu0 %v365_v7  ;;  %v377_v33 = vpack.c.bf16 %v72_v29, %v71_v28  ;;  %v73_v34 = vld [vmem:[#allocation5 + $0x60] sm:$0xff]  ;;  %v74_v35 = vld [vmem:[#allocation5 + $0x68] sm:$0xff]  ;;  %v398_v36 = vpack.c.bf16 %v159_v32, %v158_v31  ;;  %v160_v37 = vld [vmem:[#allocation7 + $0x50] sm:$0xff] }
  0x40   :  { %367 = vmatprep.subr.bf16.mxu0 %v518_v0  ;;  %v161_v38 = vld [vmem:[#allocation7 + $0x58] sm:$0xff]  ;;  %v380_v39 = vpack.c.bf16 %v74_v35, %v73_v34  ;;  %v75_v40 = vld [vmem:[#allocation5 + $0x70] sm:$0xff]  ;;  %v162_v43 = vld [vmem:[#allocation7 + $0x60] sm:$0xff] }
  0x41   :  { %390 = vmatpush3.bf16.msra.mxu1 %v389_v18  ;;  %v76_v41 = vld [vmem:[#allocation5 + $0x78] sm:$0xff]  ;;  %v401_v42 = vpack.c.bf16 %v161_v38, %v160_v37  ;;  %v163_v44 = vld [vmem:[#allocation7 + $0x68] sm:$0xff]  ;;  %v164_v47 = vld [vmem:[#allocation7 + $0x70] sm:$0xff] }
  0x42   :  { %391 = vmatprep.subr.bf16.mxu1 %v518_v0  ;;  %v383_v45 = vpack.c.bf16 %v76_v41, %v75_v40  ;;  %v404_v46 = vpack.c.bf16 %v163_v44, %v162_v43  ;;  %v165_v48 = vld [vmem:[#allocation7 + $0x78] sm:$0xff] }
  0x43   :  { %369 = vmatpush3.bf16.msra.mxu0 %v368_v14  ;;  %v60_v49 = vld [vmem:[#allocation2] sm:$0x1]  ;;  %v407_v50 = vpack.c.bf16 %v165_v48, %v164_v47 }
  0x44   :  { %370 = vmatprep.subr.bf16.mxu0 %v518_v0  ;;  %v147_v51 = vld [vmem:[%s631_s2] sm:$0x1]  ;;  %s489_s2 = scalar_lea.vmem %s247_s9, 32 }
  0x45   :  { %393 = vmatpush3.bf16.msra.mxu1 %v392_v24  ;;  %v236_v55 = vld [vmem:[%s633_s4] sm:$0x1]  ;;  %p491_p12 = scmp.lt.s32.totalorder %s489_s2, %s485_s10 }
  0x46   :  { %394 = vmatprep.subr.bf16.mxu1 %v518_v0  ;;  %v237_v56 = vmul.f32 %v236_v55, %v60_v49 }
  0x47   :  { %372 = vmatpush3.bf16.msra.mxu0 %v371_v21  ;;  %p492_p13 = por %p491_p12, %p490_p11 }
  0x48   :  { %373 = vmatprep.subr.bf16.mxu0 %v518_v0 }
  0x49   :  { %396 = vmatpush3.bf16.msra.mxu1 %v395_v30  ;;  %p493_p0 = pnand %p492_p13, %p486_p10 }
  0x4a   :  { %397 = vmatprep.subr.bf16.mxu1 %v518_v0 }
  0x4b   :  { %375 = vmatpush3.bf16.msra.mxu0 %v374_v27 }
  0x4c   :  { %376 = vmatprep.subr.bf16.mxu0 %v518_v0 }
  0x4d   :  { %399 = vmatpush3.bf16.msra.mxu1 %v398_v36 }
  0x4e   :  { %400 = vmatprep.subr.bf16.mxu1 %v518_v0 }
  0x4f   :  { %378 = vmatpush3.bf16.msra.mxu0 %v377_v33 }
  0x50   :  { %379 = vmatprep.subr.bf16.mxu0 %v518_v0 }
  0x51   :  { %402 = vmatpush3.bf16.msra.mxu1 %v401_v42 }
  0x52   :  { %403 = vmatprep.subr.bf16.mxu1 %v518_v0 }
  0x53   :  { %381 = vmatpush3.bf16.msra.mxu0 %v380_v39 }
  0x54   :  { %382 = vmatprep.subr.bf16.mxu0 %v518_v0 }
  0x55   :  { %405 = vmatpush3.bf16.msra.mxu1 %v404_v46 }
  0x56   :  { %406 = vmatprep.subr.bf16.mxu1 %v518_v0 }
  0x57   :  { %384 = vmatpush3.bf16.msra.mxu0 %v383_v45 }
  0x59   :  { %408 = vmatpush3.bf16.msra.mxu1 %v407_v50 }
  0x5a   :  { %324 = vmatmul.mubr.f32.vlgmr.msra.gmra.mrb[0].mxu0 %v60_v49 }
 0x12d   :  { %v143_v52 = vpop.f32.mrb[0].mxu0 }
 0x12e   :  { %vm148_vm1 = vcmp.ge.f32.partialorder %v143_v52, %v147_v51  ;;  %v325_v53 = vpop.f32.mrb[1].mxu0 }
 0x12f   :  { %359 = vmatmul.mubr.msk.f32.vlgmr.msra.gmra.mrb[0].mxu1 %vm148_vm1, %v521_v54 }
 0x202   :  { %v232_v57 = vpop.f32.mrb[0].mxu1 }
 0x203   :  { %v238_v58 = vadd.f32 %v237_v56, %v232_v57  ;;  %v360_v59 = vpop.f32.mrb[1].mxu1 }
 0x205   :  { %239 = vst [vmem:[#allocation8] sm:$0x1] %v238_v58 }
 0x206   :  { %496 = shalt.err (!%p493_p0)
}
 0x207   :  { %s497_s4 = scalar_lea.hbm %s634_s5, 16 }
 0x208   :  { %p498_p1 = scmp.ne.s32.totalorder %s634_s5, %s497_s4  ;;  %p501_p2 = scmp.lt.u32.totalorder %s497_s4, %s634_s5 }
 0x20a   :  { %p503_p3 = pnand %p501_p2, %p498_p1 }
 0x20c   :  { %506 = shalt.err (!%p503_p3)
}
 0x20d   :  { %249 = dma.vmem_to_hbm [thread:$0]  %s247_s9, 16, %s634_s5, [#allocation4]  }
 0x20e   :  { %511 = dma.done.wait [#allocation4], 16  }
 0x20f   :  { %512 = vsyncadd [#allocation4], 4294967280 }
 0x210   :  { %253 = vsyncpa [#allocation3], 1 }
 0x211   :  { %254 = vsyncpa [#allocation6], 1 }
 0x212   :  { %255 = vsyncpa [#allocation4], 1 }

</bundles_post_ra>
